<compile_context>
chip_gen: v7x
topology: tpu7x:2x2x1
jax: 0.10.0
libtpu: 0.0.40
codegen_flags: <defaults>
</compile_context>

<pallas_src>
import functools

import jax
import jax.numpy as jnp
from jax.experimental import pallas as pl
from jax.experimental.pallas import tpu as pltpu


# ----------------------------- small helpers --------------------------------
def _round_up(v, m):
    return (v + m - 1) // m * m


def _round_down(v, m):
    return max(m, v // m * m)


def _sublane_multiple(itemsize):
    # f32 -> 8, bf16 -> 16, int8/fp8 -> 32 (sublane packing).
    return max(8, 32 // max(1, itemsize))


def _vmem_capacity_bytes():
    """Per-core VMEM capacity; conservative (v7x = 64 MiB) fallback."""
    try:
        info = pltpu.get_tpu_info()
        for attr in ("vmem_capacity_bytes", "vmem_size_bytes", "vmem_bytes"):
            v = getattr(info, attr, None)
            if v:
                return int(v)
    except Exception:
        pass
    return 64 << 20


def _vmem_limit_bytes():
    cap = _vmem_capacity_bytes()
    # ~0.8 * capacity, leave >= 12 MiB headroom: ~102 MiB on v5e/v6e (128 MiB),
    # ~51 MiB on v7x (64 MiB). Floor at 32 MiB.
    return int(max(32 << 20, min(cap * 4 // 5, cap - (12 << 20))))


def _choose_tiles(R, S, itemsize, vmem_limit):
    """(TR, TS) for the two-pass path: sublane-multiple rows, 128-multiple
    lanes, sized so the scale pass (2 in + 2 out buffers) stays under the
    scoped-VMEM limit. Keeps >=2 row blocks when possible so both v7x
    TensorCores get work on the (serial-spatial) squeeze pass."""
    m = _sublane_multiple(itemsize)
    R_ceil = _round_up(R, m)
    S_ceil = _round_up(S, 128)
    block_budget = max(1 << 20, (vmem_limit - (4 << 20)) // 4)
    if R_ceil >= 2 * m:
        TR = min(512, _round_down(R_ceil // 2, m))
    else:
        TR = R_ceil
    TR = min(TR, R_ceil)
    ts_budget = _round_down(block_budget // (TR * itemsize), 128)
    TS = max(128, min(S_ceil, ts_budget))
    return TR, TS


# --------------------- two-pass path: squeeze then scale ---------------------
def _make_sum_kernel(S, TS):
    has_tail = (S % TS) != 0

    def kernel(x_ref, sum_ref):
        # x_ref: (TR, TS) tile; sum_ref: (TR, 1) f32, resident across the
        # spatial ("arbitrary") grid axis.
        s = pl.program_id(1)

        @pl.when(s == 0)
        def _():
            sum_ref[...] = jnp.zeros_like(sum_ref)

        x = x_ref[...].astype(jnp.float32)
        if has_tail:
            # Ragged spatial tail: zero lanes past S (partial-block data is
            # undefined), so no wrapper-side pad / slice is needed.
            col = s * TS + jax.lax.broadcasted_iota(jnp.int32, x.shape, 1)
            x = jnp.where(col < S, x, 0.0)
        sum_ref[...] += jnp.sum(x, axis=1, keepdims=True)

    return kernel


def _scale_kernel(x_ref, g_ref, o_ref):
    # Gate cast once to the input dtype: bf16 inputs multiply in bf16
    # (v6e/v7x bf16 VALU); f32 inputs unchanged. OOB lanes of partial output
    # blocks are dropped by Pallas on writeback.
    o_ref[...] = x_ref[...] * g_ref[...].astype(o_ref.dtype)


def _se_two_pass(x, w1, b1, w2, b2, vmem_limit):
    N, C = x.shape[0], x.shape[1]
    S = x.shape[2] * x.shape[3] * x.shape[4]
    R = N * C
    itemsize = jnp.dtype(x.dtype).itemsize
    x2 = x.reshape(R, S)

    TR, TS = _choose_tiles(R, S, itemsize, vmem_limit)
    n_r = pl.cdiv(R, TR)
    n_s = pl.cdiv(S, TS)

    # Pass 1: per-(batch, channel) spatial sums (tiled f32 reduction).
    sums = pl.pallas_call(
        _make_sum_kernel(S, TS),
        out_shape=jax.ShapeDtypeStruct((R, 1), jnp.float32),
        grid_spec=pltpu.PrefetchScalarGridSpec(
            num_scalar_prefetch=0,
            grid=(n_r, n_s),                         # reduction axis last
            in_specs=[pl.BlockSpec((TR, TS), lambda r, s: (r, s))],
            out_specs=pl.BlockSpec((TR, 1), lambda r, s: (r, 0)),
        ),
        compiler_params=pltpu.CompilerParams(
            dimension_semantics=("parallel", "arbitrary"),
            vmem_limit_bytes=vmem_limit),
    )(x2)

    # Excite: tiny batched FCs + sigmoid in plain XLA (negligible FLOPs).
    f32 = jnp.float32
    mean = sums.reshape(N, C) * (1.0 / float(S))                      # (N, C)
    h = jnp.maximum(mean @ w1.astype(f32).T + b1.astype(f32), 0.0)    # (N, Cr)
    gate = jax.nn.sigmoid(h @ w2.astype(f32).T + b2.astype(f32))      # (N, C)
    gate2 = gate.reshape(R, 1)

    # Pass 2: lane-dense broadcast scale.
    out2 = pl.pallas_call(
        _scale_kernel,
        out_shape=jax.ShapeDtypeStruct((R, S), x.dtype),
        grid_spec=pltpu.PrefetchScalarGridSpec(
            num_scalar_prefetch=0,
            grid=(n_r, n_s),
            in_specs=[pl.BlockSpec((TR, TS), lambda r, s: (r, s)),
                      pl.BlockSpec((TR, 1), lambda r, s: (r, 0))],
            out_specs=pl.BlockSpec((TR, TS), lambda r, s: (r, s)),
        ),
        compiler_params=pltpu.CompilerParams(
            dimension_semantics=("parallel", "parallel"),
            vmem_limit_bytes=vmem_limit),
    )(x2, gate2)
    return out2.reshape(x.shape)


# ------------- fused path: squeeze + excite + scale in one kernel ------------
def _se_fused(x, w1, b1, w2, b2, vmem_limit):
    N, C = x.shape[0], x.shape[1]
    Cr = w1.shape[0]
    S = x.shape[2] * x.shape[3] * x.shape[4]
    x3 = x.reshape(N, C, S)

    f32 = jnp.float32
    w1t = w1.astype(f32).T                    # (C, Cr)
    b1r = b1.astype(f32).reshape(1, Cr)       # (1, Cr)
    w2f = w2.astype(f32)                      # (C, Cr)
    b2c = b2.astype(f32).reshape(C, 1)        # (C, 1)
    inv_S = 1.0 / float(S)

    def kernel(x_ref, w1t_ref, b1_ref, w2_ref, b2_ref, o_ref):
        xv = x_ref[0]                                                   # (C, S)
        # Squeeze: f32 global mean per channel.
        mean = jnp.sum(xv.astype(f32), axis=1, keepdims=True) * inv_S   # (C, 1)
        # Excite: tiny matvecs as broadcast + reduce (VPU/XLU, off the MXU).
        h = jnp.sum(w1t_ref[...] * mean, axis=0, keepdims=True) + b1_ref[...]
        h = jnp.maximum(h, 0.0)                                         # (1, Cr)
        g = jnp.sum(w2_ref[...] * h, axis=1, keepdims=True) + b2_ref[...]
        gate = jax.nn.sigmoid(g)                                        # (C, 1)
        # Scale in the input dtype (bf16 stays bf16 on v6e/v7x).
        o_ref[0] = xv * gate.astype(o_ref.dtype)

    out3 = pl.pallas_call(
        kernel,
        out_shape=jax.ShapeDtypeStruct((N, C, S), x.dtype),
        grid_spec=pltpu.PrefetchScalarGridSpec(
            num_scalar_prefetch=0,
            grid=(N,),
            in_specs=[
                pl.BlockSpec((1, C, S), lambda n: (n, 0, 0)),
                pl.BlockSpec((C, Cr), lambda n: (0, 0)),
                pl.BlockSpec((1, Cr), lambda n: (0, 0)),
                pl.BlockSpec((C, Cr), lambda n: (0, 0)),
                pl.BlockSpec((C, 1), lambda n: (0, 0)),
            ],
            out_specs=pl.BlockSpec((1, C, S), lambda n: (n, 0, 0)),
        ),
        compiler_params=pltpu.CompilerParams(
            dimension_semantics=("parallel",),
            vmem_limit_bytes=vmem_limit),
    )(x3, w1t, b1r, w2f, b2c)
    return out3.reshape(x.shape)


# --------------------------------- wrapper -----------------------------------
@functools.partial(jax.jit, static_argnames=("force_two_pass",))
def se_module(x, w1, b1, w2, b2, *, force_two_pass=False):
    """x: (N, C, D, H, W). w1: (Cr, C), b1: (Cr,), w2: (C, Cr), b2: (C,)."""
    N, C, D, H, W = x.shape
    S = D * H * W
    itemsize = jnp.dtype(x.dtype).itemsize
    vmem_limit = _vmem_limit_bytes()

    # Fused eligibility: (in + out double-buffered) per-batch slab plus f32
    # intermediates plus headroom must fit the per-generation VMEM budget.
    m = _sublane_multiple(itemsize)
    slab_pad = _round_up(C, m) * _round_up(S, 128)
    fused_need = 4 * slab_pad * itemsize + slab_pad * 4 + (2 << 20)
    if (not force_two_pass) and fused_need <= vmem_limit:
        return _se_fused(x, w1, b1, w2, b2, vmem_limit)
    return _se_two_pass(x, w1, b1, w2, b2, vmem_limit)

    # TODO(synk): optionally expose input_output_aliases on the scale pass for
    # callers that donate x (avoids allocating a second N*C*S HBM buffer).


# --------------------------------- demo --------------------------------------
def _reference(x, w1, b1, w2, b2):
    xf = x.astype(jnp.float32)
    s = jnp.mean(xf, axis=(2, 3, 4))                           # (N, C)
    h = jnp.maximum(s @ w1.astype(jnp.float32).T + b1.astype(jnp.float32), 0.0)
    g = jax.nn.sigmoid(h @ w2.astype(jnp.float32).T + b2.astype(jnp.float32))
    return (xf * g[:, :, None, None, None]).astype(x.dtype)


if __name__ == "__main__":
    key = jax.random.PRNGKey(0)
    cases = [
        # (N, C, D, H, W, reduction)
        (2, 8, 8, 8, 8, 2),     # lane-aligned spatial (S = 512)
        (1, 12, 5, 7, 6, 4),    # ragged rows (N*C = 12) + ragged spatial (S = 210)
    ]
    for i, (N, C, D, H, W, red) in enumerate(cases):
        kk = jax.random.fold_in(key, i)
        kx, kw1, kb1, kw2, kb2 = jax.random.split(kk, 5)
        Cr = C // red
        x = jax.random.normal(kx, (N, C, D, H, W), dtype=jnp.float32)
        w1 = jax.random.normal(kw1, (Cr, C), dtype=jnp.float32) * 0.2
        b1 = jax.random.normal(kb1, (Cr,), dtype=jnp.float32) * 0.1
        w2 = jax.random.normal(kw2, (C, Cr), dtype=jnp.float32) * 0.2
        b2 = jax.random.normal(kb2, (C,), dtype=jnp.float32) * 0.1

        ref = _reference(x, w1, b1, w2, b2)
        out_fused = jax.block_until_ready(se_module(x, w1, b1, w2, b2))
        out_two = jax.block_until_ready(
            se_module(x, w1, b1, w2, b2, force_two_pass=True))

        assert out_fused.shape == x.shape and out_two.shape == x.shape
        assert jnp.allclose(out_fused, ref, atol=1e-5, rtol=1e-5)
        assert jnp.allclose(out_two, ref, atol=1e-5, rtol=1e-5)

    print("KERNEL_OK")
</pallas_src>

<mosaic_0001>
module attributes {stable_mosaic.version = 11 : i64} {
  func.func @kernel(%arg0: i32, %arg1: memref<1x8x512xf32, #tpu.memory_space<vmem>>, %arg2: memref<8x4xf32, #tpu.memory_space<vmem>>, %arg3: memref<1x4xf32, #tpu.memory_space<vmem>>, %arg4: memref<8x4xf32, #tpu.memory_space<vmem>>, %arg5: memref<8x1xf32, #tpu.memory_space<vmem>>, %arg6: memref<1x8x512xf32, #tpu.memory_space<vmem>>) attributes {dimension_semantics = [#tpu.dimension_semantics<parallel>], iteration_bounds = array<i64: 2>, scalar_prefetch = 0 : i64, scratch_operands = 0 : i64, tpu.core_type = #tpu.core_type<tc>, window_params = [{transform_indices = @transform_0, window_bounds = array<i64: 1, 8, 512>}, {pipeline_mode = #tpu.pipeline_mode<synchronous>, transform_indices = @transform_1, window_bounds = array<i64: 8, 4>}, {pipeline_mode = #tpu.pipeline_mode<synchronous>, transform_indices = @transform_2, window_bounds = array<i64: 1, 4>}, {pipeline_mode = #tpu.pipeline_mode<synchronous>, transform_indices = @transform_3, window_bounds = array<i64: 8, 4>}, {pipeline_mode = #tpu.pipeline_mode<synchronous>, transform_indices = @transform_4, window_bounds = array<i64: 8, 1>}, {transform_indices = @transform_5, window_bounds = array<i64: 1, 8, 512>}]} {
    %c0 = arith.constant 0 : index
    %c0_0 = arith.constant 0 : index
    %c0_1 = arith.constant 0 : index
    %0 = vector.load %arg1[%c0, %c0_0, %c0_1] : memref<1x8x512xf32, #tpu.memory_space<vmem>>, vector<1x8x512xf32>
    %1 = vector.shape_cast %0 : vector<1x8x512xf32> to vector<8x512xf32>
    %cst = arith.constant dense<0.000000e+00> : vector<8xf32>
    %2 = vector.multi_reduction <add>, %1, %cst [1] : vector<8x512xf32> to vector<8xf32>
    %3 = vector.shape_cast %2 : vector<8xf32> to vector<8x1xf32>
    %cst_2 = arith.constant 0.001953125 : f32
    %4 = vector.broadcast %cst_2 : f32 to vector<8x1xf32>
    %5 = arith.mulf %3, %4 : vector<8x1xf32>
    %c0_3 = arith.constant 0 : index
    %c0_4 = arith.constant 0 : index
    %6 = vector.load %arg2[%c0_3, %c0_4] : memref<8x4xf32, #tpu.memory_space<vmem>>, vector<8x4xf32>
    %7 = vector.broadcast %5 : vector<8x1xf32> to vector<8x4xf32>
    %8 = arith.mulf %6, %7 : vector<8x4xf32>
    %cst_5 = arith.constant dense<0.000000e+00> : vector<4xf32>
    %9 = vector.multi_reduction <add>, %8, %cst_5 [0] : vector<8x4xf32> to vector<4xf32>
    %10 = vector.shape_cast %9 : vector<4xf32> to vector<1x4xf32>
    %c0_6 = arith.constant 0 : index
    %c0_7 = arith.constant 0 : index
    %11 = vector.load %arg3[%c0_6, %c0_7] : memref<1x4xf32, #tpu.memory_space<vmem>>, vector<1x4xf32>
    %12 = arith.addf %10, %11 : vector<1x4xf32>
    %cst_8 = arith.constant 0.000000e+00 : f32
    %13 = vector.broadcast %cst_8 : f32 to vector<1x4xf32>
    %14 = arith.maximumf %12, %13 : vector<1x4xf32>
    %c0_9 = arith.constant 0 : index
    %c0_10 = arith.constant 0 : index
    %15 = vector.load %arg4[%c0_9, %c0_10] : memref<8x4xf32, #tpu.memory_space<vmem>>, vector<8x4xf32>
    %16 = vector.broadcast %14 : vector<1x4xf32> to vector<8x4xf32>
    %17 = arith.mulf %15, %16 : vector<8x4xf32>
    %cst_11 = arith.constant dense<0.000000e+00> : vector<8xf32>
    %18 = vector.multi_reduction <add>, %17, %cst_11 [1] : vector<8x4xf32> to vector<8xf32>
    %19 = vector.shape_cast %18 : vector<8xf32> to vector<8x1xf32>
    %c0_12 = arith.constant 0 : index
    %c0_13 = arith.constant 0 : index
    %20 = vector.load %arg5[%c0_12, %c0_13] : memref<8x1xf32, #tpu.memory_space<vmem>>, vector<8x1xf32>
    %21 = arith.addf %19, %20 : vector<8x1xf32>
    %22 = arith.negf %21 : vector<8x1xf32>
    %23 = math.exp %22 : vector<8x1xf32>
    %cst_14 = arith.constant 1.000000e+00 : f32
    %24 = vector.broadcast %cst_14 : f32 to vector<8x1xf32>
    %25 = arith.addf %24, %23 : vector<8x1xf32>
    %26 = arith.divf %24, %25 : vector<8x1xf32>
    %27 = vector.broadcast %26 : vector<8x1xf32> to vector<8x512xf32>
    %28 = arith.mulf %1, %27 : vector<8x512xf32>
    %c0_15 = arith.constant 0 : index
    %c0_16 = arith.constant 0 : index
    %c0_17 = arith.constant 0 : index
    %29 = vector.load %arg6[%c0_15, %c0_16, %c0_17] : memref<1x8x512xf32, #tpu.memory_space<vmem>>, vector<1x8x512xf32>
    %30 = vector.shape_cast %29 : vector<1x8x512xf32> to vector<8x512xf32>
    %31 = vector.shape_cast %28 : vector<8x512xf32> to vector<1x8x512xf32>
    tpu.vector_store %arg6[%c0_15, %c0_16, %c0_17], %31 {strides = array<i32>} : memref<1x8x512xf32, #tpu.memory_space<vmem>>, vector<1x8x512xf32>,
    return
  }
  func.func @transform_0(%arg0: i32) -> (i32, i32, i32) {
    %c0_i32 = arith.constant 0 : i32
    %c0_i32_0 = arith.constant 0 : i32
    %c0_i32_1 = arith.constant 0 : i32
    return %arg0, %c0_i32, %c0_i32_0 : i32, i32, i32
  }
  func.func @transform_1(%arg0: i32) -> (i32, i32) {
    %c0_i32 = arith.constant 0 : i32
    %c0_i32_0 = arith.constant 0 : i32
    %c0_i32_1 = arith.constant 0 : i32
    return %c0_i32, %c0_i32_0 : i32, i32
  }
  func.func @transform_2(%arg0: i32) -> (i32, i32) {
    %c0_i32 = arith.constant 0 : i32
    %c0_i32_0 = arith.constant 0 : i32
    %c0_i32_1 = arith.constant 0 : i32
    return %c0_i32, %c0_i32_0 : i32, i32
  }
  func.func @transform_3(%arg0: i32) -> (i32, i32) {
    %c0_i32 = arith.constant 0 : i32
    %c0_i32_0 = arith.constant 0 : i32
    %c0_i32_1 = arith.constant 0 : i32
    return %c0_i32, %c0_i32_0 : i32, i32
  }
  func.func @transform_4(%arg0: i32) -> (i32, i32) {
    %c0_i32 = arith.constant 0 : i32
    %c0_i32_0 = arith.constant 0 : i32
    %c0_i32_1 = arith.constant 0 : i32
    return %c0_i32, %c0_i32_0 : i32, i32
  }
  func.func @transform_5(%arg0: i32) -> (i32, i32, i32) {
    %c0_i32 = arith.constant 0 : i32
    %c0_i32_0 = arith.constant 0 : i32
    %c0_i32_1 = arith.constant 0 : i32
    return %arg0, %c0_i32, %c0_i32_0 : i32, i32, i32
  }
}

</mosaic_0001>

<bundles_post_ra>
// kernel: se_module.1
= control target key start
LH: loop header
LB: loop body
LE: loop exit
PB: predicated region body
PF: predicated region fallthrough
CT: control target
= control target key end

     0   :  { %s401_s18 = smov 0   ;;  %s439_s0 = inlined_call_operand.vmem [shape: f32[2,8,512], index: 0, kind: input, shape index: {}]   ;;  %s440_s1 = inlined_call_operand.vmem [shape: f32[8,4], index: 1, kind: input, shape index: {}]   ;;  %s441_s2 = inlined_call_operand.vmem [shape: f32[1,4], index: 2, kind: input, shape index: {}]   ;;  %s442_s3 = inlined_call_operand.vmem [shape: f32[8,4], index: 3, kind: input, shape index: {}]   ;;  %s443_s4 = inlined_call_operand.vmem [shape: f32[8,1], index: 4, kind: input, shape index: {}]   ;;  %s444_s5 = inlined_call_operand.vmem [shape: f32[2,8,512], index: 5, kind: output, shape index: {}]  }
   0x1 LB: > { %s333_s19 = sadd.s32 4294967295, %s368_s18   ;;  %p337_p0 = scmp.ge.s32.totalorder %s368_s18, 1  ;;  %s368_s18 = sphi %s401_s18, %s15_s18  }
   0x2   : > { %p187_p1 = scmp.lt.s32.totalorder %s368_s18, 3 }
   0x4   : > { %p188_p2 = pnand %p337_p0, %p187_p1 }
   0x5   : > { %p215_p3 = scmp.lt.s32.totalorder (!%p188_p2), %s333_s19, 1  ;;  %v235_v7 = vld [vmem:[%s440_s1] sm:$0xff] (!%p188_p2)  ;;  %vm237_vm0 = vcmask (!%p188_p2), 31744   ;;  %v249_v15 = vlaneseq (!%p188_p2)  ;;  %v370_v28 = vmov (!%p188_p2), 0  }
   0x6   : > { %191 = sbr.rel (%p188_p2) target bundleno = 493 (0x1ed), region = 40  ;;  %v245_v19 = vld [vmem:[%s441_s2] sm:$0x1] (!%p188_p2)  ;;  %356 = vset.pattern.permute.xlu1 (!%p188_p2), %v370_v28  ;;  %357 = vset.pattern.permute.xlu0 (!%p188_p2), %v370_v28 }
   0x7   : > { %v250_v18 = vshrl.u32 (!%p188_p2), %v249_v15, 7  ;;  %v248_v24 = vld [vmem:[%s442_s3] sm:$0xff] (!%p188_p2) }
   0x8   : > { %v257_v29 = vld [vmem:[%s443_s4] sm:$0xff] (!%p188_p2) }
   0x9   : > { %v251_v22 = vsub.s32 (!%p188_p2), 0, %v250_v18 }
   0xd   : > { %s446_s19 = smov (!%p215_p3, %s333_s19), 1 }
   0xe   : > { %s345_s20 = sshll.u32 %s446_s19, 5 }
   0xf   : > { %s219_s23 = scalar_lea.vmem %s439_s0, %s345_s20  ;;  %s224_s9 = scalar_lea.vmem %s444_s5, %s345_s20 }
  0x10   : > { %v225_v0 = vld [vmem:[%s219_s23] sm:$0xff]  ;;  %v226_v1 = vld [vmem:[%s219_s23 + $0x8] sm:$0xff]  ;;  %v227_v2 = vld [vmem:[%s219_s23 + $0x10] sm:$0xff] }
  0x11   : > { %v229_v3 = vadd.f32 %v226_v1, %v225_v0  ;;  %v228_v4 = vld [vmem:[%s219_s23 + $0x18] sm:$0xff] }
  0x13   : > { %v230_v5 = vadd.f32 %v229_v3, %v227_v2 }
  0x15   : > { %v231_v6 = vadd.f32 %v230_v5, %v228_v4 }
  0x17   : > { %232 = vadd.xlane.f32.xlu0 %v231_v6 }
  0xa4   : > { %v233_v8 = vpop.xlane.xlu0 %232 }
  0xa5   : > { %v234_v9 = vmul.f32 0.001953125, %v233_v8 }
  0xa7   : > { %v236_v10 = vmul.f32 %v235_v7, %v234_v9 }
  0xa9   : > { %v238_v11 = vsel %vm237_vm0, %v236_v10, 0.0 }
  0xaa   : > { %v239_v12 = vrot.slane %v238_v11, 4 }
  0xac   : > { %v240_v13 = vadd.f32 %v239_v12, %v238_v11 }
  0xae   : > { %v241_v14 = vrot.slane %v240_v13, 2 }
  0xb0   : > { %v242_v16 = vadd.f32 %v241_v14, %v240_v13 }
  0xb2   : > { %v243_v17 = vrot.slane %v242_v16, 1 }
  0xb4   : > { %v244_v20 = vadd.f32 %v243_v17, %v242_v16 }
  0xb6   : > { %v246_v21 = vadd.f32 %v245_v19, %v244_v20 }
  0xb8   : > { %v247_v23 = vmax.f32 %v246_v21, 0.0 }
  0xba   : > { %v252_v25 = vrot.slane %v247_v23, %v251_v22 }
  0xbc   : > { %v253_v26 = vmul.f32 %v252_v25, %v248_v24 }
  0xbe   : > { %v254_v27 = vsel %vm237_vm0, %v253_v26, 0.0 }
  0xbf   : > { %255 = vadd.xlane.f32.xlu0 %v254_v27 }
 0x14c   : > { %v256_v30 = vpop.xlane.xlu0 %255 }
 0x14d   : > { %v258_v31 = vadd.f32 %v257_v29, %v256_v30 }
 0x14f   : > { %v342_v32 = vmul.f32 -1.442695, %v258_v31 }
 0x151   : > { %358 = vpow2.f32 %v342_v32 }
 0x15b   : > { %v359_v33 = vpop.eup %358 }
 0x15c   : > { %v262_v34 = vadd.f32 1.0, %v359_v33 }
 0x15e   : > { %360 = vrcp.f32 %v262_v34 }
 0x168   : > { %v361_v35 = vpop.eup %360 }
 0x169   : > { %267 = vperm.xlu1 %356, %v361_v35  }
 0x1e8   : > { %v268_v36 = vpop.permute.xlu1 %267 }
 0x1e9   : > { %v270_v37 = vmul.f32 %v268_v36, %v225_v0  ;;  %v271_v38 = vmul.f32 %v268_v36, %v226_v1  ;;  %v272_v39 = vmul.f32 %v268_v36, %v227_v2  ;;  %v273_v40 = vmul.f32 %v268_v36, %v228_v4 }
 0x1eb   : > { %274 = vst [vmem:[%s224_s9] sm:$0xff] %v270_v37  ;;  %275 = vst [vmem:[%s224_s9 + $0x8] sm:$0xff] %v271_v38 }
 0x1ec   : > { %276 = vst [vmem:[%s224_s9 + $0x10] sm:$0xff] %v272_v39  ;;  %277 = vst [vmem:[%s224_s9 + $0x18] sm:$0xff] %v273_v40 }
 0x1ed PF: > { %s15_s18 = sadd.s32 1, %s368_s18  }
 0x1ee   : > { %p12_p4 = scmp.ge.s32.totalorder %s15_s18, 4  }
 0x1f0   :  { %14 = sbr.rel (!%p12_p4) target bundleno = 1 (0x1), region = 70 }

</bundles_post_ra>
